<compile_context>
chip_gen: v6e
topology: v6e:2x2x1
jax: 0.10.0
libtpu: 0.0.40
codegen_flags: <defaults>
</compile_context>

<pallas_src>
import functools

import jax
import jax.numpy as jnp
from jax import lax
from jax.experimental import pallas as pl
from jax.experimental.pallas import tpu as pltpu

SMOOTH = 1e-5


def _vmem_budget_bytes():
    """Scoped-VMEM budget: generation-aware with a conservative fallback."""
    try:
        phys = int(pltpu.get_tpu_info().vmem_capacity_bytes)
    except Exception:
        phys = 64 << 20          # v7x per-TensorCore size: safe on every gen
    return max(32 << 20, min(96 << 20, phys - (16 << 20)))


def _default_num_cores():
    """Explicit 2-TensorCore split only on v7x; v5e/v6e are single-TC chips."""
    try:
        kind = jax.devices()[0].device_kind.lower()
    except Exception:
        return 1
    return 2 if ("v7" in kind or "tpu7" in kind) else 1


def _dice_sums_kernel(x_ref, t_ref, inter_ref, zs_ref, ys_ref, *,
                      hw, tn, tiles_per_core, softmax, need_mask):
    """Accumulate per-(b, c) sum(x*t), sum(x*x), sum(t*t) over lane tiles."""
    k = pl.program_id(1)

    @pl.when(k == 0)
    def _():
        inter_ref[...] = jnp.zeros_like(inter_ref)
        zs_ref[...] = jnp.zeros_like(zs_ref)
        ys_ref[...] = jnp.zeros_like(ys_ref)

    def accumulate(valid):
        x = x_ref[...].astype(jnp.float32)            # (B, C, TN)
        t = t_ref[...].astype(jnp.float32)
        if softmax:
            # Fused channel softmax: max/sum across sublanes (XLU), exp (EUP).
            x = x - jnp.max(x, axis=1, keepdims=True)
            ex = jnp.exp(x)
            x = ex / jnp.sum(ex, axis=1, keepdims=True)
        if valid is not None:
            lane = lax.broadcasted_iota(jnp.int32, x.shape, x.ndim - 1)
            m = lane < valid
            x = jnp.where(m, x, 0.0)
            t = jnp.where(m, t, 0.0)
        inter_ref[...] += jnp.sum(x * t, axis=-1, keepdims=True)   # (B, C, 1)
        zs_ref[...] += jnp.sum(x * x, axis=-1, keepdims=True)
        ys_ref[...] += jnp.sum(t * t, axis=-1, keepdims=True)

    if need_mask:
        c = pl.program_id(0)
        g = c * tiles_per_core + k            # global (unclamped) tile index
        valid = hw - g * tn                   # <= 0 for duplicated tail tiles

        @pl.when(valid >= tn)                 # full tiles: cheap unmasked path
        def _():
            accumulate(None)

        @pl.when(valid < tn)                  # only the ragged / dup tail
        def _():
            accumulate(valid)
    else:
        accumulate(None)


def dice_loss(inputs, target, weight=None, softmax=False, *,
              num_cores=None, target_block_bytes=8 << 20):
    """Pallas DiceLoss forward. inputs/target: (B, C, H, W) arrays."""
    assert inputs.shape == target.shape, (
        f"predict {inputs.shape} & target {target.shape} shape do not match")
    B, C, H, W = inputs.shape

    if weight is None:
        weight = jnp.ones((C,), jnp.float32)
    else:
        weight = jnp.asarray(weight, jnp.float32).reshape(-1)
        assert weight.shape[0] == C, (
            f"weight length {weight.shape[0]} != n_classes {C}")

    HW = H * W
    # Free views of the contiguous NCHW array; channel axis kept for fused
    # softmax and class-wise accumulators.
    x = inputs.reshape(B, C, HW)
    t = target.reshape(B, C, HW)

    if num_cores is None:
        num_cores = _default_num_cores()

    # ---- lane-tile sizing: ~8 MiB per input per step, double-buffered,
    #      capped by the generation's scoped-VMEM budget. ----
    vmem_budget = _vmem_budget_bytes()
    c_pad = ((C + 7) // 8) * 8                              # sublane padding
    chunk_bytes = B * c_pad * 128 * (x.dtype.itemsize + t.dtype.itemsize)
    # Budget for both inputs in ONE pipeline buffer (2 buffers total).
    per_buf = min(2 * target_block_bytes,
                  max(chunk_bytes, (vmem_budget - (8 << 20)) // 2))
    if HW < 128:
        tn = HW                                             # full-extent lanes
    else:
        chunks = max(1, per_buf // chunk_bytes)
        tn = min(128 * chunks, (HW // 128) * 128)
    # TODO(synk): if B*C is so large that a single 128-lane chunk exceeds the
    # VMEM budget, the row axis would also need tiling; not needed here.
    num_tiles = pl.cdiv(HW, tn)
    num_cores = max(1, min(num_cores, num_tiles))

    if num_cores > 1 and HW >= 128:
        # Prefer a tile size whose tile count splits evenly across cores so
        # the clamped duplicate tail block (wasted HBM read) disappears.
        for cpt in range(tn // 128, 0, -1):
            nt = pl.cdiv(HW, 128 * cpt)
            if nt % num_cores == 0:
                tn, num_tiles = 128 * cpt, nt
                break

    tiles_per_core = pl.cdiv(num_tiles, num_cores)
    need_mask = (HW % tn != 0) or (tiles_per_core * num_cores != num_tiles)

    def in_map(c, k):
        g = c * tiles_per_core + k
        return (0, 0, jnp.minimum(g, num_tiles - 1))    # clamp duplicate tail

    kernel = functools.partial(
        _dice_sums_kernel, hw=HW, tn=tn, tiles_per_core=tiles_per_core,
        softmax=softmax, need_mask=need_mask)

    acc_shape = jax.ShapeDtypeStruct((num_cores, B, C, 1), jnp.float32)
    acc_spec = pl.BlockSpec((None, B, C, 1), lambda c, k: (c, 0, 0, 0))

    if num_cores > 1:
        # Genuine TensorCore sharding of the leading axis (v7x only).
        sems = (pltpu.CORE_PARALLEL, pltpu.ARBITRARY)
    else:
        sems = ("arbitrary", "arbitrary")

    inter, zs, ys = pl.pallas_call(
        kernel,
        out_shape=(acc_shape, acc_shape, acc_shape),
        grid_spec=pltpu.PrefetchScalarGridSpec(
            num_scalar_prefetch=0,
            grid=(num_cores, tiles_per_core),
            in_specs=[
                pl.BlockSpec((B, C, tn), in_map),
                pl.BlockSpec((B, C, tn), in_map),
            ],
            out_specs=[acc_spec, acc_spec, acc_spec],
        ),
        compiler_params=pltpu.CompilerParams(
            dimension_semantics=sems,
            vmem_limit_bytes=int(vmem_budget)),
    )(x, t)

    # Tiny finalize on 3 * num_cores * B * C scalars (plain JAX).
    def per_class(a):                     # (num_cores, B, C, 1) -> (C,)
        return a.sum(axis=(0, 1, 3))

    inter_c = per_class(inter)
    z_c = per_class(zs)
    y_c = per_class(ys)
    dice = 1.0 - (2.0 * inter_c + SMOOTH) / (z_c + y_c + SMOOTH)
    return jnp.sum(dice * weight) / C


def dice_loss_ref(inputs, target, weight=None, softmax=False):
    """Pure-JAX reference matching the PyTorch module."""
    B, C, H, W = inputs.shape
    if softmax:
        inputs = jax.nn.softmax(inputs, axis=1)
    if weight is None:
        weight = [1.0] * C
    loss = 0.0
    for i in range(C):
        s = inputs[:, i].astype(jnp.float32)
        tg = target[:, i].astype(jnp.float32)
        intersect = jnp.sum(s * tg)
        y_sum = jnp.sum(tg * tg)
        z_sum = jnp.sum(s * s)
        dice = 1.0 - (2.0 * intersect + SMOOTH) / (z_sum + y_sum + SMOOTH)
        loss = loss + dice * weight[i]
    return loss / C


if __name__ == "__main__":
    key = jax.random.PRNGKey(0)
    B, C, H, W = 2, 4, 16, 16
    k1, k2 = jax.random.split(key)

    # Predictions (post-softmax probabilities) and one-hot target.
    logits = jax.random.normal(k1, (B, C, H, W), jnp.float32)
    inputs = jax.nn.softmax(logits, axis=1)
    labels = jax.random.randint(k2, (B, H, W), 0, C)
    target = jax.nn.one_hot(labels, C, axis=1, dtype=jnp.float32)  # (B,C,H,W)

    out = jax.block_until_ready(dice_loss(inputs, target))
    ref = dice_loss_ref(inputs, target)
    assert jnp.allclose(out, ref, rtol=1e-5, atol=1e-6), (out, ref)

    # Weighted + fused-softmax path (softmax computed inside the kernel).
    w = [0.5, 1.0, 2.0, 0.25]
    out_w = jax.block_until_ready(
        dice_loss(logits, target, weight=w, softmax=True))
    ref_w = dice_loss_ref(logits, target, weight=w, softmax=True)
    assert jnp.allclose(out_w, ref_w, rtol=1e-5, atol=1e-6), (out_w, ref_w)

    print("KERNEL_OK")
</pallas_src>

<mosaic_0001>
module attributes {stable_mosaic.version = 11 : i64} {
  func.func @_dice_sums_kernel(%arg0: i32, %arg1: i32, %arg2: memref<2x4x256xf32, #tpu.memory_space<vmem>>, %arg3: memref<2x4x256xf32, #tpu.memory_space<vmem>>, %arg4: memref<1x2x4x1xf32, #tpu.memory_space<vmem>>, %arg5: memref<1x2x4x1xf32, #tpu.memory_space<vmem>>, %arg6: memref<1x2x4x1xf32, #tpu.memory_space<vmem>>) attributes {dimension_semantics = [#tpu.dimension_semantics<arbitrary>, #tpu.dimension_semantics<arbitrary>], iteration_bounds = array<i64: 1, 1>, scalar_prefetch = 0 : i64, scratch_operands = 0 : i64, tpu.core_type = #tpu.core_type<tc>, window_params = [{transform_indices = @transform_0, window_bounds = array<i64: 2, 4, 256>}, {transform_indices = @transform_1, window_bounds = array<i64: 2, 4, 256>}, {transform_indices = @transform_2, window_bounds = array<i64: 1, 2, 4, 1>}, {transform_indices = @transform_3, window_bounds = array<i64: 1, 2, 4, 1>}, {transform_indices = @transform_4, window_bounds = array<i64: 1, 2, 4, 1>}]} {
    %c0_i32 = arith.constant 0 : i32
    %0 = arith.cmpi eq, %arg1, %c0_i32 : i32
    %1 = arith.extui %0 : i1 to i32
    %c0_i32_0 = arith.constant 0 : i32
    %2 = arith.cmpi ne, %1, %c0_i32_0 : i32
    scf.if %2 {
      %cst_32 = arith.constant 0.000000e+00 : f32
      %32 = vector.broadcast %cst_32 : f32 to vector<2x4x1xf32>
      %c0_33 = arith.constant 0 : index
      %c0_34 = arith.constant 0 : index
      %c0_35 = arith.constant 0 : index
      %c0_36 = arith.constant 0 : index
      %33 = vector.load %arg4[%c0_33, %c0_34, %c0_35, %c0_36] : memref<1x2x4x1xf32, #tpu.memory_space<vmem>>, vector<1x2x4x1xf32>
      %34 = vector.shape_cast %33 : vector<1x2x4x1xf32> to vector<2x4x1xf32>
      %35 = vector.shape_cast %32 : vector<2x4x1xf32> to vector<1x2x4x1xf32>
      tpu.vector_store %arg4[%c0_33, %c0_34, %c0_35, %c0_36], %35 {strides = array<i32>} : memref<1x2x4x1xf32, #tpu.memory_space<vmem>>, vector<1x2x4x1xf32>,
      %cst_37 = arith.constant 0.000000e+00 : f32
      %36 = vector.broadcast %cst_37 : f32 to vector<2x4x1xf32>
      %c0_38 = arith.constant 0 : index
      %c0_39 = arith.constant 0 : index
      %c0_40 = arith.constant 0 : index
      %c0_41 = arith.constant 0 : index
      %37 = vector.load %arg5[%c0_38, %c0_39, %c0_40, %c0_41] : memref<1x2x4x1xf32, #tpu.memory_space<vmem>>, vector<1x2x4x1xf32>
      %38 = vector.shape_cast %37 : vector<1x2x4x1xf32> to vector<2x4x1xf32>
      %39 = vector.shape_cast %36 : vector<2x4x1xf32> to vector<1x2x4x1xf32>
      tpu.vector_store %arg5[%c0_38, %c0_39, %c0_40, %c0_41], %39 {strides = array<i32>} : memref<1x2x4x1xf32, #tpu.memory_space<vmem>>, vector<1x2x4x1xf32>,
      %cst_42 = arith.constant 0.000000e+00 : f32
      %40 = vector.broadcast %cst_42 : f32 to vector<2x4x1xf32>
      %c0_43 = arith.constant 0 : index
      %c0_44 = arith.constant 0 : index
      %c0_45 = arith.constant 0 : index
      %c0_46 = arith.constant 0 : index
      %41 = vector.load %arg6[%c0_43, %c0_44, %c0_45, %c0_46] : memref<1x2x4x1xf32, #tpu.memory_space<vmem>>, vector<1x2x4x1xf32>
      %42 = vector.shape_cast %41 : vector<1x2x4x1xf32> to vector<2x4x1xf32>
      %43 = vector.shape_cast %40 : vector<2x4x1xf32> to vector<1x2x4x1xf32>
      tpu.vector_store %arg6[%c0_43, %c0_44, %c0_45, %c0_46], %43 {strides = array<i32>} : memref<1x2x4x1xf32, #tpu.memory_space<vmem>>, vector<1x2x4x1xf32>,
    } else {
    }
    %c0 = arith.constant 0 : index
    %c0_1 = arith.constant 0 : index
    %c0_2 = arith.constant 0 : index
    %3 = vector.load %arg2[%c0, %c0_1, %c0_2] : memref<2x4x256xf32, #tpu.memory_space<vmem>>, vector<2x4x256xf32>
    %c0_3 = arith.constant 0 : index
    %c0_4 = arith.constant 0 : index
    %c0_5 = arith.constant 0 : index
    %4 = vector.load %arg3[%c0_3, %c0_4, %c0_5] : memref<2x4x256xf32, #tpu.memory_space<vmem>>, vector<2x4x256xf32>
    %c0_6 = arith.constant 0 : index
    %c0_7 = arith.constant 0 : index
    %c0_8 = arith.constant 0 : index
    %c0_9 = arith.constant 0 : index
    %5 = vector.load %arg4[%c0_6, %c0_7, %c0_8, %c0_9] : memref<1x2x4x1xf32, #tpu.memory_space<vmem>>, vector<1x2x4x1xf32>
    %6 = vector.shape_cast %5 : vector<1x2x4x1xf32> to vector<2x4x1xf32>
    %7 = arith.mulf %3, %4 : vector<2x4x256xf32>
    %cst = arith.constant dense<0.000000e+00> : vector<2x4xf32>
    %8 = vector.multi_reduction <add>, %7, %cst [2] : vector<2x4x256xf32> to vector<2x4xf32>
    %9 = vector.shape_cast %8 : vector<2x4xf32> to vector<2x4x1xf32>
    %10 = arith.addf %6, %9 : vector<2x4x1xf32>
    %c0_10 = arith.constant 0 : index
    %c0_11 = arith.constant 0 : index
    %c0_12 = arith.constant 0 : index
    %c0_13 = arith.constant 0 : index
    %11 = vector.load %arg4[%c0_10, %c0_11, %c0_12, %c0_13] : memref<1x2x4x1xf32, #tpu.memory_space<vmem>>, vector<1x2x4x1xf32>
    %12 = vector.shape_cast %11 : vector<1x2x4x1xf32> to vector<2x4x1xf32>
    %13 = vector.shape_cast %10 : vector<2x4x1xf32> to vector<1x2x4x1xf32>
    tpu.vector_store %arg4[%c0_10, %c0_11, %c0_12, %c0_13], %13 {strides = array<i32>} : memref<1x2x4x1xf32, #tpu.memory_space<vmem>>, vector<1x2x4x1xf32>,
    %c0_14 = arith.constant 0 : index
    %c0_15 = arith.constant 0 : index
    %c0_16 = arith.constant 0 : index
    %c0_17 = arith.constant 0 : index
    %14 = vector.load %arg5[%c0_14, %c0_15, %c0_16, %c0_17] : memref<1x2x4x1xf32, #tpu.memory_space<vmem>>, vector<1x2x4x1xf32>
    %15 = vector.shape_cast %14 : vector<1x2x4x1xf32> to vector<2x4x1xf32>
    %16 = arith.mulf %3, %3 : vector<2x4x256xf32>
    %cst_18 = arith.constant dense<0.000000e+00> : vector<2x4xf32>
    %17 = vector.multi_reduction <add>, %16, %cst_18 [2] : vector<2x4x256xf32> to vector<2x4xf32>
    %18 = vector.shape_cast %17 : vector<2x4xf32> to vector<2x4x1xf32>
    %19 = arith.addf %15, %18 : vector<2x4x1xf32>
    %c0_19 = arith.constant 0 : index
    %c0_20 = arith.constant 0 : index
    %c0_21 = arith.constant 0 : index
    %c0_22 = arith.constant 0 : index
    %20 = vector.load %arg5[%c0_19, %c0_20, %c0_21, %c0_22] : memref<1x2x4x1xf32, #tpu.memory_space<vmem>>, vector<1x2x4x1xf32>
    %21 = vector.shape_cast %20 : vector<1x2x4x1xf32> to vector<2x4x1xf32>
    %22 = vector.shape_cast %19 : vector<2x4x1xf32> to vector<1x2x4x1xf32>
    tpu.vector_store %arg5[%c0_19, %c0_20, %c0_21, %c0_22], %22 {strides = array<i32>} : memref<1x2x4x1xf32, #tpu.memory_space<vmem>>, vector<1x2x4x1xf32>,
    %c0_23 = arith.constant 0 : index
    %c0_24 = arith.constant 0 : index
    %c0_25 = arith.constant 0 : index
    %c0_26 = arith.constant 0 : index
    %23 = vector.load %arg6[%c0_23, %c0_24, %c0_25, %c0_26] : memref<1x2x4x1xf32, #tpu.memory_space<vmem>>, vector<1x2x4x1xf32>
    %24 = vector.shape_cast %23 : vector<1x2x4x1xf32> to vector<2x4x1xf32>
    %25 = arith.mulf %4, %4 : vector<2x4x256xf32>
    %cst_27 = arith.constant dense<0.000000e+00> : vector<2x4xf32>
    %26 = vector.multi_reduction <add>, %25, %cst_27 [2] : vector<2x4x256xf32> to vector<2x4xf32>
    %27 = vector.shape_cast %26 : vector<2x4xf32> to vector<2x4x1xf32>
    %28 = arith.addf %24, %27 : vector<2x4x1xf32>
    %c0_28 = arith.constant 0 : index
    %c0_29 = arith.constant 0 : index
    %c0_30 = arith.constant 0 : index
    %c0_31 = arith.constant 0 : index
    %29 = vector.load %arg6[%c0_28, %c0_29, %c0_30, %c0_31] : memref<1x2x4x1xf32, #tpu.memory_space<vmem>>, vector<1x2x4x1xf32>
    %30 = vector.shape_cast %29 : vector<1x2x4x1xf32> to vector<2x4x1xf32>
    %31 = vector.shape_cast %28 : vector<2x4x1xf32> to vector<1x2x4x1xf32>
    tpu.vector_store %arg6[%c0_28, %c0_29, %c0_30, %c0_31], %31 {strides = array<i32>} : memref<1x2x4x1xf32, #tpu.memory_space<vmem>>, vector<1x2x4x1xf32>,
    return
  }
  func.func @transform_0(%arg0: i32, %arg1: i32) -> (i32, i32, i32) {
    %c1_i32 = arith.constant 1 : i32
    %0 = arith.muli %arg0, %c1_i32 : i32
    %1 = arith.addi %0, %arg1 : i32
    %c0_i32 = arith.constant 0 : i32
    %2 = arith.minsi %1, %c0_i32 : i32
    %c0_i32_0 = arith.constant 0 : i32
    %c0_i32_1 = arith.constant 0 : i32
    %c0_i32_2 = arith.constant 0 : i32
    return %c0_i32_0, %c0_i32_1, %2 : i32, i32, i32
  }
  func.func @transform_1(%arg0: i32, %arg1: i32) -> (i32, i32, i32) {
    %c1_i32 = arith.constant 1 : i32
    %0 = arith.muli %arg0, %c1_i32 : i32
    %1 = arith.addi %0, %arg1 : i32
    %c0_i32 = arith.constant 0 : i32
    %2 = arith.minsi %1, %c0_i32 : i32
    %c0_i32_0 = arith.constant 0 : i32
    %c0_i32_1 = arith.constant 0 : i32
    %c0_i32_2 = arith.constant 0 : i32
    return %c0_i32_0, %c0_i32_1, %2 : i32, i32, i32
  }
  func.func @transform_2(%arg0: i32, %arg1: i32) -> (i32, i32, i32, i32) {
    %c0_i32 = arith.constant 0 : i32
    %c0_i32_0 = arith.constant 0 : i32
    %c0_i32_1 = arith.constant 0 : i32
    %c0_i32_2 = arith.constant 0 : i32
    return %arg0, %c0_i32, %c0_i32_0, %c0_i32_1 : i32, i32, i32, i32
  }
  func.func @transform_3(%arg0: i32, %arg1: i32) -> (i32, i32, i32, i32) {
    %c0_i32 = arith.constant 0 : i32
    %c0_i32_0 = arith.constant 0 : i32
    %c0_i32_1 = arith.constant 0 : i32
    %c0_i32_2 = arith.constant 0 : i32
    return %arg0, %c0_i32, %c0_i32_0, %c0_i32_1 : i32, i32, i32, i32
  }
  func.func @transform_4(%arg0: i32, %arg1: i32) -> (i32, i32, i32, i32) {
    %c0_i32 = arith.constant 0 : i32
    %c0_i32_0 = arith.constant 0 : i32
    %c0_i32_1 = arith.constant 0 : i32
    %c0_i32_2 = arith.constant 0 : i32
    return %arg0, %c0_i32, %c0_i32_0, %c0_i32_1 : i32, i32, i32, i32
  }
}

</mosaic_0001>

<bundles_post_ra>
// kernel: tpu_custom_call.1
= control target key start
LH: loop header
LB: loop body
LE: loop exit
PB: predicated region body
PF: predicated region fallthrough
CT: control target
= control target key end

     0   :  { %10 = vsyncpa [#allocation3], 0  ;;  %s332_s0 = inlined_call_operand.hbm [shape: f32[2,4,256], index: 0, kind: input, shape index: {}]   ;;  %s333_s1 = inlined_call_operand.hbm [shape: f32[2,4,256], index: 1, kind: input, shape index: {}]   ;;  %s334_s2 = inlined_call_operand.vmem [shape: f32[1,2,4,1], index: 2, kind: output, shape index: {0}]   ;;  %s335_s3 = inlined_call_operand.vmem [shape: f32[1,2,4,1], index: 3, kind: output, shape index: {1}]   ;;  %s336_s4 = inlined_call_operand.vmem [shape: f32[1,2,4,1], index: 4, kind: output, shape index: {2}]  }
   0x1   :  { %11 = vsyncpa [#allocation5], 0  ;;  %s218_s15 = smov [#allocation2]  }
   0x2   :  { %s23_s16 = sshll.u32 %s218_s15, 4  ;;  %s24_s16 = int_to_ptr.vmem [resolvable:$true] %s23_s16 }
   0x3   :  { %s182_s17 = scalar_lea.vmem %s24_s16, 256  ;;  %p187_p1 = scmp.lt.s32.totalorder %s24_s16, %s24_s16 }
   0x4   :  { %p183_p0 = scmp.ne.s32.totalorder %s24_s16, %s182_s17  ;;  %p188_p2 = scmp.lt.s32.totalorder %s182_s17, %s182_s17 }
   0x6   :  { %p189_p3 = por %p188_p2, %p187_p1 }
   0x8   :  { %p190_p4 = pnand %p189_p3, %p183_p0 }
   0xa   :  { %193 = shalt.err (!%p190_p4)
}
   0xb   :  { %s219_s18 = smov 128   ;;  %s220_s19 = smov 8  }
   0xc   :  { %29 = dma.hbm_to_vmem [thread:$0]  %s332_s0, 256, %s24_s16, [#allocation3], %s219_s18, %s219_s18, %s220_s19  }
   0xd   :  { %s221_s22 = smov [#allocation4]  }
   0xe   :  { %s41_s23 = sshll.u32 %s221_s22, 4  ;;  %s42_s23 = int_to_ptr.vmem [resolvable:$true] %s41_s23 }
   0xf   :  { %s202_s24 = scalar_lea.vmem %s42_s23, 256  ;;  %p207_p6 = scmp.lt.s32.totalorder %s42_s23, %s42_s23 }
  0x10   :  { %p203_p5 = scmp.ne.s32.totalorder %s42_s23, %s202_s24  ;;  %p208_p7 = scmp.lt.s32.totalorder %s202_s24, %s202_s24 }
  0x12   :  { %p209_p8 = por %p208_p7, %p207_p6 }
  0x14   :  { %p210_p9 = pnand %p209_p8, %p203_p5 }
  0x16   :  { %213 = shalt.err (!%p210_p9)
}
  0x17   :  { %47 = dma.hbm_to_vmem [thread:$0]  %s333_s1, 256, %s42_s23, [#allocation5], %s219_s18, %s219_s18, %s220_s19  }
  0x18   :  { %214 = dma.done.wait [#allocation3], 256  }
  0x19   :  { %215 = vsyncadd [#allocation3], 4294967040 }
  0x1a   :  { %216 = dma.done.wait [#allocation5], 256  }
  0x1b   :  { %217 = vsyncadd [#allocation5], 4294967040  ;;  %vm66_vm0 = vcmask 3072   ;;  %v222_v0 = vmov 0.0   ;;  %v73_v1 = vld [vmem:[#allocation2] sm:$0xff]  ;;  %vm87_vm1 = vcmask 1043456  }
  0x1c   :  { %69 = vst.msk [vmem:[%s335_s3] sm:$0xf] %vm66_vm0, %v222_v0  ;;  %67 = vst.msk [vmem:[%s334_s2] sm:$0xf] %vm66_vm0, %v222_v0  ;;  %v75_v2 = vld [vmem:[#allocation4] sm:$0xff]  ;;  %v74_v3 = vld [vmem:[#allocation2 + $0x8] sm:$0xff]  ;;  %v105_v4 = vmul.f32 %v73_v1, %v73_v1 }
  0x1d   :  { %68 = vst.msk [vmem:[%s334_s2 + $0x4] sm:$0xf] %vm66_vm0, %v222_v0  ;;  %70 = vst.msk [vmem:[%s335_s3 + $0x4] sm:$0xf] %vm66_vm0, %v222_v0  ;;  %v79_v5 = vmul.f32 %v75_v2, %v73_v1  ;;  %v106_v6 = vmul.f32 %v74_v3, %v74_v3  ;;  %v76_v7 = vld [vmem:[#allocation4 + $0x8] sm:$0xff]  ;;  %v129_v10 = vmul.f32 %v75_v2, %v75_v2 }
  0x1e   :  { %71 = vst.msk [vmem:[%s336_s4] sm:$0xf] %vm66_vm0, %v222_v0  ;;  %72 = vst.msk [vmem:[%s336_s4 + $0x4] sm:$0xf] %vm66_vm0, %v222_v0  ;;  %v80_v8 = vmul.f32 %v76_v7, %v74_v3  ;;  %v130_v9 = vmul.f32 %v76_v7, %v76_v7  ;;  %v109_v11 = vcombine.high %v105_v4, %v105_v4  ;;  %v113_v12 = vsel %vm87_vm1, %v105_v4, 0.0 }
  0x1f   :  { %v83_v13 = vcombine.high %v79_v5, %v79_v5  ;;  %v88_v14 = vsel %vm87_vm1, %v79_v5, 0.0  ;;  %v110_v15 = vcombine.high %v106_v6, %v106_v6  ;;  %v118_v16 = vsel %vm87_vm1, %v106_v6, 0.0 }
  0x20   :  { %v84_v17 = vcombine.high %v80_v8, %v80_v8  ;;  %v114_v18 = vsel %vm87_vm1, %v109_v11, 0.0  ;;  %v93_v20 = vsel %vm87_vm1, %v80_v8, 0.0  ;;  %v134_v21 = vcombine.high %v130_v9, %v130_v9 }
  0x21   :  { %v89_v19 = vsel %vm87_vm1, %v83_v13, 0.0  ;;  %v115_v22 = vadd.f32 %v114_v18, %v113_v12  ;;  %v119_v24 = vsel %vm87_vm1, %v110_v15, 0.0  ;;  %v133_v26 = vcombine.high %v129_v10, %v129_v10 }
  0x22   :  { %v90_v23 = vadd.f32 %v89_v19, %v88_v14  ;;  %v94_v25 = vsel %vm87_vm1, %v84_v17, 0.0  ;;  %v120_v27 = vadd.f32 %v119_v24, %v118_v16  ;;  %v142_v29 = vsel %vm87_vm1, %v130_v9, 0.0 }
  0x23   :  { %116 = vadd.xlane.f32.xlu1 %v115_v22  ;;  %v95_v28 = vadd.f32 %v94_v25, %v93_v20  ;;  %v143_v30 = vsel %vm87_vm1, %v134_v21, 0.0  ;;  %v137_v31 = vsel %vm87_vm1, %v129_v10, 0.0  ;;  %v138_v32 = vsel %vm87_vm1, %v133_v26, 0.0  ;;  %v103_v35 = vld [vmem:[%s335_s3] sm:$0xf] }
  0x24   :  { %91 = vadd.xlane.f32.xlu0 %v90_v23  ;;  %v144_v33 = vadd.f32 %v143_v30, %v142_v29  ;;  %v139_v34 = vadd.f32 %v138_v32, %v137_v31  ;;  %v77_v36 = vld [vmem:[%s334_s2] sm:$0xf]  ;;  %v104_v41 = vld [vmem:[%s335_s3 + $0x4] sm:$0xf] }
  0x25   :  { %v78_v42 = vld [vmem:[%s334_s2 + $0x4] sm:$0xf]  ;;  %v127_v48 = vld [vmem:[%s336_s4] sm:$0xf] }
  0x26   :  { %v128_v47 = vld [vmem:[%s336_s4 + $0x4] sm:$0xf] }
  0x27   :  { %121 = vadd.xlane.f32.xlu1 %v120_v27 }
  0x28   :  { %96 = vadd.xlane.f32.xlu0 %v95_v28 }
  0x2b   :  { %145 = vadd.xlane.f32.xlu1 %v144_v33 }
  0x2c   :  { %140 = vadd.xlane.f32.xlu0 %v139_v34 }
  0xac   :  { %v117_v37 = vpop.xlane.xlu1 %116 }
  0xad   :  { %v92_v38 = vpop.xlane.xlu0 %91  ;;  %v123_v39 = vadd.f32 %v117_v37, %v103_v35 }
  0xae   :  { %v98_v40 = vadd.f32 %v92_v38, %v77_v36 }
  0xaf   :  { %125 = vst.msk [vmem:[%s335_s3] sm:$0xf] %vm66_vm0, %v123_v39 }
  0xb0   :  { %101 = vst.msk [vmem:[%s334_s2] sm:$0xf] %vm66_vm0, %v98_v40  ;;  %v122_v43 = vpop.xlane.xlu1 %121 }
  0xb1   :  { %v97_v44 = vpop.xlane.xlu0 %96  ;;  %v124_v45 = vadd.f32 %v122_v43, %v104_v41 }
  0xb2   :  { %v99_v46 = vadd.f32 %v97_v44, %v78_v42 }
  0xb3   :  { %126 = vst.msk [vmem:[%s335_s3 + $0x4] sm:$0xf] %vm66_vm0, %v124_v45 }
  0xb4   :  { %102 = vst.msk [vmem:[%s334_s2 + $0x4] sm:$0xf] %vm66_vm0, %v99_v46  ;;  %v146_v49 = vpop.xlane.xlu1 %145 }
  0xb5   :  { %v141_v50 = vpop.xlane.xlu0 %140  ;;  %v148_v51 = vadd.f32 %v146_v49, %v128_v47 }
  0xb6   :  { %v147_v52 = vadd.f32 %v141_v50, %v127_v48 }
  0xb7   :  { %150 = vst.msk [vmem:[%s336_s4 + $0x4] sm:$0xf] %vm66_vm0, %v148_v51 }
  0xb8   :  { %149 = vst.msk [vmem:[%s336_s4] sm:$0xf] %vm66_vm0, %v147_v52 }
  0xb9   :  { %163 = vsyncpa [#allocation3], 1 }
  0xba   :  { %164 = vsyncpa [#allocation5], 1 }

</bundles_post_ra>
